<compile_context>
chip_gen: v7x
topology: tpu7x:2x2x1
jax: 0.10.0
libtpu: 0.0.40
codegen_flags: <defaults>
</compile_context>

<pallas_src>
import functools

import jax
import jax.numpy as jnp
import numpy as np
from jax.experimental import pallas as pl
from jax.experimental.pallas import tpu as pltpu


def fusion_kernel(x1_ref, x2_ref, w1s_ref, b1_ref, w2s_ref, b2s_ref, o_ref, *, inv_hw):
    # x1_ref / x2_ref / o_ref blocks: (Bblk, C, HW) in the caller's dtype.
    x1 = x1_ref[...]
    x2 = x2_ref[...]

    # Adaptive avg / max pool to 1x1 -> (Bblk, C) pooled statistics.
    # Sums accumulate in f32 (matters for bf16 inputs); max is exact in any dtype.
    p_a1 = jnp.sum(x1.astype(jnp.float32), axis=-1) * inv_hw
    p_m1 = jnp.max(x1, axis=-1).astype(jnp.float32)
    p_a2 = jnp.sum(x2.astype(jnp.float32), axis=-1) * inv_hw
    p_m2 = jnp.max(x2, axis=-1).astype(jnp.float32)

    # Linear(4C -> Ch) applied as four (Bblk,C)@(C,Ch) matmuls on the packed weight
    # slabs (no pooled-stat concat), batched over the block's batch axis, + ReLU.
    h = (jnp.dot(p_a1, w1s_ref[0], preferred_element_type=jnp.float32)
         + jnp.dot(p_m1, w1s_ref[1], preferred_element_type=jnp.float32)
         + jnp.dot(p_a2, w1s_ref[2], preferred_element_type=jnp.float32)
         + jnp.dot(p_m2, w1s_ref[3], preferred_element_type=jnp.float32)
         + b1_ref[...])
    h = jnp.maximum(h, 0.0)                                          # (Bblk, Ch)

    # Linear(Ch -> 2C) split into even (x1) / odd (x2) output columns so the
    # (B, 2C) -> (B, C, 2) reshape + softmax(dim=-1) becomes a pairwise softmax.
    la = jnp.dot(h, w2s_ref[0], preferred_element_type=jnp.float32) + b2s_ref[0]  # (Bblk, C)
    lb = jnp.dot(h, w2s_ref[1], preferred_element_type=jnp.float32) + b2s_ref[1]  # (Bblk, C)

    m = jnp.maximum(la, lb)
    ea = jnp.exp(la - m)
    eb = jnp.exp(lb - m)
    inv = pl.reciprocal(ea + eb, approx=True)        # EUP slot; ~1e-3 rel error
    wa = (ea * inv).astype(x1.dtype)[:, :, None]     # (Bblk, C, 1) weight for x1
    wb = (eb * inv).astype(x2.dtype)[:, :, None]     # (Bblk, C, 1) weight for x2

    # Final weighting in the native dtype (bf16 stays bf16 end-to-end).
    o_ref[...] = (wa * x1 + wb * x2).astype(o_ref.dtype)


def _vmem_capacity_bytes():
    """Per-core VMEM capacity; conservative (v7x-like, 64 MiB) if the query fails."""
    try:
        info = pltpu.get_tpu_info()
        cap = getattr(info, "vmem_capacity_bytes", None)
        if cap:
            return int(cap)
    except Exception:
        pass
    return 64 << 20


def _choose_bblk(B, C, HW, itemsize, target_bytes, min_grid):
    """Largest divisor of B giving ~target_bytes native tiles and >= min_grid grid
    steps (capped at B), preferring multiples of 8 (full sublanes in the matmuls)."""
    per_image = max(1, C * HW * itemsize)
    cap = max(1, int(target_bytes) // per_image)
    cap = min(cap, B)
    cap = min(cap, max(1, B // min(min_grid, B)))    # keep the pipeline >= min_grid deep
    candidates = [d for d in range(1, cap + 1) if B % d == 0]
    return max(candidates, key=lambda d: (d % 8 == 0, d))


def feature_fusion(x1, x2, w1, b1, w2, b2):
    """x1, x2: (B, C, H, W). w1: (Ch, 4C), b1: (Ch,), w2: (2C, Ch), b2: (2C,)."""
    B, C, H, W = x1.shape
    HW = H * W
    Ch = w1.shape[0]
    itemsize = jnp.dtype(x1.dtype).itemsize

    # No spatial padding: blocks use the full HW extent (equal to the array dim),
    # so the reshape below is metadata-only and there are no extra HBM copies.
    x1f = x1.reshape(B, C, HW)
    x2f = x2.reshape(B, C, HW)

    # Generation-aware tile / VMEM budget.
    vmem_cap = _vmem_capacity_bytes()
    small_vmem = vmem_cap < (100 << 20)              # v7x-class (64 MiB per TC)
    limit_cap = (40 << 20) if small_vmem else (96 << 20)
    pref_tile = (4 << 20) if small_vmem else (8 << 20)
    min_grid = 8 if small_vmem else 2
    headroom = 2 << 20
    # 3 tile-sized arrays double-buffered in the native dtype, plus ~2 live full-tile
    # f32 temporaries inside the kernel (the pooled-sum casts): budget accordingly.
    per_tile_factor = 6 + (2 * 4) // itemsize
    target_tile = max(128 << 10, min(pref_tile, (limit_cap - headroom) // per_tile_factor))

    Bblk = _choose_bblk(B, C, HW, itemsize, target_tile, min_grid)
    nb = B // Bblk

    tile_native = Bblk * C * HW * itemsize
    tile_f32 = Bblk * C * HW * 4
    vmem_limit = int(min(limit_cap, max(16 << 20, 6 * tile_native + 2 * tile_f32 + headroom)))

    # Parameter plumbing (tiny, done once): pack the four Linear(4C->Ch) slabs as
    # (4, C, Ch) and the even/odd halves of Linear(Ch->2C) as (2, Ch, C), all in the
    # (Bblk, C) @ (C, Ch) / (Bblk, Ch) @ (Ch, C) orientation.
    w1s = jnp.stack([w1[:, 0 * C:1 * C].T,       # multiplies x1_avg
                     w1[:, 1 * C:2 * C].T,       # multiplies x1_max
                     w1[:, 2 * C:3 * C].T,       # multiplies x2_avg
                     w1[:, 3 * C:4 * C].T])      # multiplies x2_max   -> (4, C, Ch)
    b1r = b1.reshape(1, Ch)
    w2s = jnp.stack([w2[0::2, :].T, w2[1::2, :].T])                     # (2, Ch, C)
    b2s = jnp.stack([b2[0::2].reshape(1, C), b2[1::2].reshape(1, C)])   # (2, 1, C)

    kernel = functools.partial(fusion_kernel, inv_hw=1.0 / HW)

    out = pl.pallas_call(
        kernel,
        out_shape=jax.ShapeDtypeStruct((B, C, HW), x1.dtype),
        grid_spec=pltpu.PrefetchScalarGridSpec(
            num_scalar_prefetch=0,
            grid=(nb,),
            in_specs=[
                pl.BlockSpec((Bblk, C, HW), lambda b: (b, 0, 0)),
                pl.BlockSpec((Bblk, C, HW), lambda b: (b, 0, 0)),
                pl.BlockSpec((4, C, Ch), lambda b: (0, 0, 0)),
                pl.BlockSpec((1, Ch), lambda b: (0, 0)),
                pl.BlockSpec((2, Ch, C), lambda b: (0, 0, 0)),
                pl.BlockSpec((2, 1, C), lambda b: (0, 0, 0)),
            ],
            out_specs=pl.BlockSpec((Bblk, C, HW), lambda b: (b, 0, 0)),
        ),
        compiler_params=pltpu.CompilerParams(
            dimension_semantics=("parallel",),
            vmem_limit_bytes=vmem_limit,
        ),
    )(x1f, x2f, w1s, b1r, w2s, b2s)

    return out.reshape(B, C, H, W)


def feature_fusion_reference(x1, x2, w1, b1, w2, b2):
    """Pure-JAX mirror of the PyTorch forward, for verification."""
    B, C, H, W = x1.shape
    x1f = x1.reshape(B, C, -1)
    x2f = x2.reshape(B, C, -1)
    x1_avg = x1f.mean(-1)
    x1_max = x1f.max(-1)
    x2_avg = x2f.mean(-1)
    x2_max = x2f.max(-1)
    hidden = jnp.concatenate([x1_avg, x1_max, x2_avg, x2_max], axis=-1)   # (B, 4C)
    h = jnp.maximum(hidden @ w1.T + b1, 0.0)
    logits = (h @ w2.T + b2).reshape(B, C, 2)
    wts = jax.nn.softmax(logits, axis=-1)
    w1w = wts[..., 0][:, :, None, None]
    w2w = wts[..., 1][:, :, None, None]
    return w1w * x1 + w2w * x2


def _run_case(key, B, dim, H, W, reduction=1):
    Ch = 4 * dim // reduction
    k_x1, k_x2, k_w1, k_b1, k_w2, k_b2 = jax.random.split(key, 6)

    x1 = jax.random.normal(k_x1, (B, dim, H, W), dtype=jnp.float32)
    x2 = jax.random.normal(k_x2, (B, dim, H, W), dtype=jnp.float32)

    # Synthetic params matching nn.Linear(4*dim, Ch) / nn.Linear(Ch, 2*dim).
    w1 = jax.random.normal(k_w1, (Ch, 4 * dim), dtype=jnp.float32) * 0.1
    b1 = jax.random.normal(k_b1, (Ch,), dtype=jnp.float32) * 0.1
    w2 = jax.random.normal(k_w2, (2 * dim, Ch), dtype=jnp.float32) * 0.1
    b2 = jax.random.normal(k_b2, (2 * dim,), dtype=jnp.float32) * 0.1

    out = jax.block_until_ready(feature_fusion(x1, x2, w1, b1, w2, b2))
    ref = feature_fusion_reference(x1, x2, w1, b1, w2, b2)
    # Tolerance covers pl.reciprocal(approx=True) in the pairwise softmax.
    np.testing.assert_allclose(np.asarray(out), np.asarray(ref), rtol=2e-3, atol=2e-3)


if __name__ == "__main__":
    key = jax.random.PRNGKey(0)
    k0, k1, k2 = jax.random.split(key, 3)

    # 128-aligned spatial extent (H*W = 256).
    _run_case(k0, B=2, dim=8, H=16, W=16)
    # Unaligned spatial extent (H*W = 100) — no padding, masked tail stores.
    _run_case(k1, B=2, dim=8, H=10, W=10)
    # Multi-block batch path (Bblk > 1, several grid steps).
    _run_case(k2, B=16, dim=8, H=16, W=16)

    print("KERNEL_OK")
</pallas_src>

<mosaic_0001>
module attributes {stable_mosaic.version = 11 : i64} {
  func.func @fusion_kernel(%arg0: i32, %arg1: memref<1x8x256xf32, #tpu.memory_space<vmem>>, %arg2: memref<1x8x256xf32, #tpu.memory_space<vmem>>, %arg3: memref<4x8x32xf32, #tpu.memory_space<vmem>>, %arg4: memref<1x32xf32, #tpu.memory_space<vmem>>, %arg5: memref<2x32x8xf32, #tpu.memory_space<vmem>>, %arg6: memref<2x1x8xf32, #tpu.memory_space<vmem>>, %arg7: memref<1x8x256xf32, #tpu.memory_space<vmem>>) attributes {dimension_semantics = [#tpu.dimension_semantics<parallel>], iteration_bounds = array<i64: 2>, scalar_prefetch = 0 : i64, scratch_operands = 0 : i64, tpu.core_type = #tpu.core_type<tc>, window_params = [{transform_indices = @transform_0, window_bounds = array<i64: 1, 8, 256>}, {transform_indices = @transform_1, window_bounds = array<i64: 1, 8, 256>}, {pipeline_mode = #tpu.pipeline_mode<synchronous>, transform_indices = @transform_2, window_bounds = array<i64: 4, 8, 32>}, {pipeline_mode = #tpu.pipeline_mode<synchronous>, transform_indices = @transform_3, window_bounds = array<i64: 1, 32>}, {pipeline_mode = #tpu.pipeline_mode<synchronous>, transform_indices = @transform_4, window_bounds = array<i64: 2, 32, 8>}, {pipeline_mode = #tpu.pipeline_mode<synchronous>, transform_indices = @transform_5, window_bounds = array<i64: 2, 1, 8>}, {transform_indices = @transform_6, window_bounds = array<i64: 1, 8, 256>}]} {
    %c0 = arith.constant 0 : index
    %c0_0 = arith.constant 0 : index
    %c0_1 = arith.constant 0 : index
    %0 = vector.load %arg1[%c0, %c0_0, %c0_1] : memref<1x8x256xf32, #tpu.memory_space<vmem>>, vector<1x8x256xf32>
    %c0_2 = arith.constant 0 : index
    %c0_3 = arith.constant 0 : index
    %c0_4 = arith.constant 0 : index
    %1 = vector.load %arg2[%c0_2, %c0_3, %c0_4] : memref<1x8x256xf32, #tpu.memory_space<vmem>>, vector<1x8x256xf32>
    %cst = arith.constant dense<0.000000e+00> : vector<1x8xf32>
    %2 = vector.multi_reduction <add>, %0, %cst [2] : vector<1x8x256xf32> to vector<1x8xf32>
    %cst_5 = arith.constant 3.906250e-03 : f32
    %3 = vector.broadcast %cst_5 : f32 to vector<1x8xf32>
    %4 = arith.mulf %2, %3 : vector<1x8xf32>
    %cst_6 = arith.constant dense<0xFF800000> : vector<1x8xf32>
    %5 = vector.multi_reduction <maximumf>, %0, %cst_6 [2] : vector<1x8x256xf32> to vector<1x8xf32>
    %cst_7 = arith.constant dense<0.000000e+00> : vector<1x8xf32>
    %6 = vector.multi_reduction <add>, %1, %cst_7 [2] : vector<1x8x256xf32> to vector<1x8xf32>
    %cst_8 = arith.constant 3.906250e-03 : f32
    %7 = vector.broadcast %cst_8 : f32 to vector<1x8xf32>
    %8 = arith.mulf %6, %7 : vector<1x8xf32>
    %cst_9 = arith.constant dense<0xFF800000> : vector<1x8xf32>
    %9 = vector.multi_reduction <maximumf>, %1, %cst_9 [2] : vector<1x8x256xf32> to vector<1x8xf32>
    %c0_10 = arith.constant 0 : index
    %c0_11 = arith.constant 0 : index
    %c0_12 = arith.constant 0 : index
    %10 = vector.load %arg3[%c0_10, %c0_11, %c0_12] : memref<4x8x32xf32, #tpu.memory_space<vmem>>, vector<1x8x32xf32>
    %11 = vector.shape_cast %10 : vector<1x8x32xf32> to vector<8x32xf32>
    %cst_13 = arith.constant dense<0.000000e+00> : vector<1x32xf32>
    %12 = tpu.matmul %4, %11, %cst_13 {dimension_numbers = #tpu.dot_dimension_numbers<[1], [0], [0], [1], [0, 0, 1, 1], [], []>} : vector<1x8xf32>, vector<8x32xf32>, vector<1x32xf32> -> vector<1x32xf32>
    %c1 = arith.constant 1 : index
    %c0_14 = arith.constant 0 : index
    %c0_15 = arith.constant 0 : index
    %13 = vector.load %arg3[%c1, %c0_14, %c0_15] : memref<4x8x32xf32, #tpu.memory_space<vmem>>, vector<1x8x32xf32>
    %14 = vector.shape_cast %13 : vector<1x8x32xf32> to vector<8x32xf32>
    %cst_16 = arith.constant dense<0.000000e+00> : vector<1x32xf32>
    %15 = tpu.matmul %5, %14, %cst_16 {dimension_numbers = #tpu.dot_dimension_numbers<[1], [0], [0], [1], [0, 0, 1, 1], [], []>} : vector<1x8xf32>, vector<8x32xf32>, vector<1x32xf32> -> vector<1x32xf32>
    %16 = arith.addf %12, %15 : vector<1x32xf32>
    %c2 = arith.constant 2 : index
    %c0_17 = arith.constant 0 : index
    %c0_18 = arith.constant 0 : index
    %17 = vector.load %arg3[%c2, %c0_17, %c0_18] : memref<4x8x32xf32, #tpu.memory_space<vmem>>, vector<1x8x32xf32>
    %18 = vector.shape_cast %17 : vector<1x8x32xf32> to vector<8x32xf32>
    %cst_19 = arith.constant dense<0.000000e+00> : vector<1x32xf32>
    %19 = tpu.matmul %8, %18, %cst_19 {dimension_numbers = #tpu.dot_dimension_numbers<[1], [0], [0], [1], [0, 0, 1, 1], [], []>} : vector<1x8xf32>, vector<8x32xf32>, vector<1x32xf32> -> vector<1x32xf32>
    %20 = arith.addf %16, %19 : vector<1x32xf32>
    %c3 = arith.constant 3 : index
    %c0_20 = arith.constant 0 : index
    %c0_21 = arith.constant 0 : index
    %21 = vector.load %arg3[%c3, %c0_20, %c0_21] : memref<4x8x32xf32, #tpu.memory_space<vmem>>, vector<1x8x32xf32>
    %22 = vector.shape_cast %21 : vector<1x8x32xf32> to vector<8x32xf32>
    %cst_22 = arith.constant dense<0.000000e+00> : vector<1x32xf32>
    %23 = tpu.matmul %9, %22, %cst_22 {dimension_numbers = #tpu.dot_dimension_numbers<[1], [0], [0], [1], [0, 0, 1, 1], [], []>} : vector<1x8xf32>, vector<8x32xf32>, vector<1x32xf32> -> vector<1x32xf32>
    %24 = arith.addf %20, %23 : vector<1x32xf32>
    %c0_23 = arith.constant 0 : index
    %c0_24 = arith.constant 0 : index
    %25 = vector.load %arg4[%c0_23, %c0_24] : memref<1x32xf32, #tpu.memory_space<vmem>>, vector<1x32xf32>
    %26 = arith.addf %24, %25 : vector<1x32xf32>
    %cst_25 = arith.constant 0.000000e+00 : f32
    %27 = vector.broadcast %cst_25 : f32 to vector<1x32xf32>
    %28 = arith.maximumf %26, %27 : vector<1x32xf32>
    %c0_26 = arith.constant 0 : index
    %c0_27 = arith.constant 0 : index
    %c0_28 = arith.constant 0 : index
    %29 = vector.load %arg5[%c0_26, %c0_27, %c0_28] : memref<2x32x8xf32, #tpu.memory_space<vmem>>, vector<1x32x8xf32>
    %30 = vector.shape_cast %29 : vector<1x32x8xf32> to vector<32x8xf32>
    %cst_29 = arith.constant dense<0.000000e+00> : vector<1x8xf32>
    %31 = tpu.matmul %28, %30, %cst_29 {dimension_numbers = #tpu.dot_dimension_numbers<[1], [0], [0], [1], [0, 0, 1, 1], [], []>} : vector<1x32xf32>, vector<32x8xf32>, vector<1x8xf32> -> vector<1x8xf32>
    %c0_30 = arith.constant 0 : index
    %c0_31 = arith.constant 0 : index
    %c0_32 = arith.constant 0 : index
    %32 = vector.load %arg6[%c0_30, %c0_31, %c0_32] : memref<2x1x8xf32, #tpu.memory_space<vmem>>, vector<1x1x8xf32>
    %33 = vector.shape_cast %32 : vector<1x1x8xf32> to vector<1x8xf32>
    %34 = arith.addf %31, %33 : vector<1x8xf32>
    %c1_33 = arith.constant 1 : index
    %c0_34 = arith.constant 0 : index
    %c0_35 = arith.constant 0 : index
    %35 = vector.load %arg5[%c1_33, %c0_34, %c0_35] : memref<2x32x8xf32, #tpu.memory_space<vmem>>, vector<1x32x8xf32>
    %36 = vector.shape_cast %35 : vector<1x32x8xf32> to vector<32x8xf32>
    %cst_36 = arith.constant dense<0.000000e+00> : vector<1x8xf32>
    %37 = tpu.matmul %28, %36, %cst_36 {dimension_numbers = #tpu.dot_dimension_numbers<[1], [0], [0], [1], [0, 0, 1, 1], [], []>} : vector<1x32xf32>, vector<32x8xf32>, vector<1x8xf32> -> vector<1x8xf32>
    %c1_37 = arith.constant 1 : index
    %c0_38 = arith.constant 0 : index
    %c0_39 = arith.constant 0 : index
    %38 = vector.load %arg6[%c1_37, %c0_38, %c0_39] : memref<2x1x8xf32, #tpu.memory_space<vmem>>, vector<1x1x8xf32>
    %39 = vector.shape_cast %38 : vector<1x1x8xf32> to vector<1x8xf32>
    %40 = arith.addf %37, %39 : vector<1x8xf32>
    %41 = arith.maximumf %34, %40 : vector<1x8xf32>
    %42 = arith.subf %34, %41 : vector<1x8xf32>
    %43 = math.exp %42 : vector<1x8xf32>
    %44 = arith.subf %40, %41 : vector<1x8xf32>
    %45 = math.exp %44 : vector<1x8xf32>
    %46 = arith.addf %43, %45 : vector<1x8xf32>
    %47 = tpu.reciprocal %46 {approx = true} : vector<1x8xf32> -> vector<1x8xf32>
    %48 = arith.mulf %43, %47 : vector<1x8xf32>
    %49 = vector.shape_cast %48 : vector<1x8xf32> to vector<1x8x1xf32>
    %50 = arith.mulf %45, %47 : vector<1x8xf32>
    %51 = vector.shape_cast %50 : vector<1x8xf32> to vector<1x8x1xf32>
    %52 = vector.broadcast %49 : vector<1x8x1xf32> to vector<1x8x256xf32>
    %53 = arith.mulf %52, %0 : vector<1x8x256xf32>
    %54 = vector.broadcast %51 : vector<1x8x1xf32> to vector<1x8x256xf32>
    %55 = arith.mulf %54, %1 : vector<1x8x256xf32>
    %56 = arith.addf %53, %55 : vector<1x8x256xf32>
    %c0_40 = arith.constant 0 : index
    %c0_41 = arith.constant 0 : index
    %c0_42 = arith.constant 0 : index
    %57 = vector.load %arg7[%c0_40, %c0_41, %c0_42] : memref<1x8x256xf32, #tpu.memory_space<vmem>>, vector<1x8x256xf32>
    tpu.vector_store %arg7[%c0_40, %c0_41, %c0_42], %56 {strides = array<i32>} : memref<1x8x256xf32, #tpu.memory_space<vmem>>, vector<1x8x256xf32>,
    return
  }
  func.func @transform_0(%arg0: i32) -> (i32, i32, i32) {
    %c0_i32 = arith.constant 0 : i32
    %c0_i32_0 = arith.constant 0 : i32
    %c0_i32_1 = arith.constant 0 : i32
    return %arg0, %c0_i32, %c0_i32_0 : i32, i32, i32
  }
  func.func @transform_1(%arg0: i32) -> (i32, i32, i32) {
    %c0_i32 = arith.constant 0 : i32
    %c0_i32_0 = arith.constant 0 : i32
    %c0_i32_1 = arith.constant 0 : i32
    return %arg0, %c0_i32, %c0_i32_0 : i32, i32, i32
  }
  func.func @transform_2(%arg0: i32) -> (i32, i32, i32) {
    %c0_i32 = arith.constant 0 : i32
    %c0_i32_0 = arith.constant 0 : i32
    %c0_i32_1 = arith.constant 0 : i32
    %c0_i32_2 = arith.constant 0 : i32
    return %c0_i32, %c0_i32_0, %c0_i32_1 : i32, i32, i32
  }
  func.func @transform_3(%arg0: i32) -> (i32, i32) {
    %c0_i32 = arith.constant 0 : i32
    %c0_i32_0 = arith.constant 0 : i32
    %c0_i32_1 = arith.constant 0 : i32
    return %c0_i32, %c0_i32_0 : i32, i32
  }
  func.func @transform_4(%arg0: i32) -> (i32, i32, i32) {
    %c0_i32 = arith.constant 0 : i32
    %c0_i32_0 = arith.constant 0 : i32
    %c0_i32_1 = arith.constant 0 : i32
    %c0_i32_2 = arith.constant 0 : i32
    return %c0_i32, %c0_i32_0, %c0_i32_1 : i32, i32, i32
  }
  func.func @transform_5(%arg0: i32) -> (i32, i32, i32) {
    %c0_i32 = arith.constant 0 : i32
    %c0_i32_0 = arith.constant 0 : i32
    %c0_i32_1 = arith.constant 0 : i32
    %c0_i32_2 = arith.constant 0 : i32
    return %c0_i32, %c0_i32_0, %c0_i32_1 : i32, i32, i32
  }
  func.func @transform_6(%arg0: i32) -> (i32, i32, i32) {
    %c0_i32 = arith.constant 0 : i32
    %c0_i32_0 = arith.constant 0 : i32
    %c0_i32_1 = arith.constant 0 : i32
    return %arg0, %c0_i32, %c0_i32_0 : i32, i32, i32
  }
}

</mosaic_0001>

<bundles_post_ra>
// kernel: tpu_custom_call.1
= control target key start
LH: loop header
LB: loop body
LE: loop exit
PB: predicated region body
PF: predicated region fallthrough
CT: control target
= control target key end

     0   :  { %11 = vsyncpa [#allocation3], 0  ;;  %s1419_s0 = inlined_call_operand.vmem [shape: f32[2,8,256], index: 0, kind: input, shape index: {}]   ;;  %s1420_s1 = inlined_call_operand.vmem [shape: f32[2,8,256], index: 1, kind: input, shape index: {}]   ;;  %s1421_s2 = inlined_call_operand.hbm [shape: f32[4,8,32], index: 2, kind: input, shape index: {}]   ;;  %s1422_s3 = inlined_call_operand.vmem [shape: f32[1,32], index: 3, kind: input, shape index: {}]   ;;  %s1423_s4 = inlined_call_operand.vmem [shape: f32[2,32,8], index: 4, kind: input, shape index: {}]   ;;  %s1424_s5 = inlined_call_operand.vmem [shape: f32[2,1,8], index: 5, kind: input, shape index: {}]   ;;  %s1425_s6 = inlined_call_operand.hbm [shape: f32[2,8,256], index: 6, kind: output, shape index: {}]  }
   0x1   :  { %12 = vsyncpa [#allocation4], 0 }
   0x2   :  { %14 = vsyncpa [#allocation4 + $0x1], 0  ;;  %s1214_s21 = smov 0   ;;  %s1216_s22 = smov 0  }
   0x3   :  { %s1218_s23 = smov 0   ;;  %s1220_s24 = smov 0  }
   0x4 LB: > { %s1235_s25 = sadd.s32 4294967295, %s1170_s24   ;;  %s913_s26 = sadd.s32 4294967294, %s1170_s24   ;;  %s1170_s24 = sphi %s1220_s24, %s1441_s24   ;;  %s1166_s23 = sphi %s1218_s23, %s1440_s23   ;;  %s1162_s22 = sphi %s1216_s22, %s1439_s22   ;;  %s1158_s21 = sphi %s1214_s21, %s1438_s21  }
   0x5   : > { %s1239_s27 = sadd.s32 1, %s1170_s24   ;;  %s163_s28 = sadd.s32 1, %s1166_s23 }
   0x6   : > { %s160_s29 = ssub.s32 %s1170_s24, %s1239_s27  ;;  %p173_p0 = scmp.ne.s32.totalorder %s1166_s23, %s1162_s22 }
   0x7   : > { %p161_p1 = scmp.eq.s32.totalorder %s160_s29, 0  ;;  %p174_p2 = scmp.eq.s32.totalorder %s1235_s25, 1 }
   0x8   : > { %p179_p3 = scmp.ne.s32.totalorder %s1162_s22, %s1158_s21  ;;  %p180_p4 = scmp.eq.s32.totalorder %s913_s26, 1 }
   0x9   : > { %s1250_s30 = scalar_select %p161_p1, %s1166_s23, %s163_s28  }
   0xa   : > { %p1252_p5 = por %p174_p2, %p173_p0  ;;  %p1256_p6 = por %p180_p4, %p179_p3 }
   0xb   : > { %p914_p7 = scmp.ge.s32.totalorder %s1170_s24, 1  ;;  %p187_p8 = scmp.lt.s32.totalorder %s1170_s24, 3 }
   0xc   : > { %s1429_s7 = scalar_select %p1252_p5, 1, 0 }
   0xd   : > { %s1430_s8 = scalar_select %p1256_p6, 1, 0 }
   0xe   : > { %p1426_p9 = scmp.eq.s32.totalorder %s1235_s25, 0  ;;  %p1263_p10 = pnand %p914_p7, %p187_p8 }
   0xf   : > { %s1172_s10 = smov [#allocation2]   ;;  %s1076_s15 = scalar_lea.hbm %s1421_s2, 512 }
  0x10   : > { %s1431_s9 = scalar_select %p1263_p10, 1, 0 }
  0x11   : > { %s199_s11 = sshll.u32 %s1172_s10, 4  ;;  %p1021_p11 = pneg %p1263_p10  ;;  %s200_s11 = int_to_ptr.vmem [resolvable:$true] %s199_s11 }
  0x12   : > { %p1077_p13 = scmp.ne.s32.totalorder %s1421_s2, %s1076_s15  ;;  %p1083_p3 = scmp.lt.u32.totalorder %s1076_s15, %s1421_s2 }
  0x13   : > { %p1271_p12 = pnand %p1426_p9, %p1021_p11 }
  0x15   : > { %p1078_p0 = pneg %p1271_p12 }
  0x17   : > { %p1079_p1 = pnand %p1078_p0, %p1077_p13 }
  0x19   : > { %p1080_p2 = pneg %p1079_p1 }
  0x1b   : > { %p1085_p4 = pnand %p1083_p3, %p1080_p2 }
  0x1d   : > { %1088 = shalt.err (!%p1085_p4)
}
  0x1e   : > { %s1089_s20 = scalar_lea.vmem %s200_s11, 512  ;;  %p1097_p9 = scmp.lt.s32.totalorder %s200_s11, %s200_s11 }
  0x1f   : > { %p1090_p7 = scmp.ne.s32.totalorder %s200_s11, %s1089_s20  ;;  %p1098_p6 = scmp.lt.s32.totalorder %s1089_s20, %s1089_s20 }
  0x21   : > { %p1092_p8 = pnand %p1090_p7, %p1078_p0  ;;  %p1099_p5 = por %p1098_p6, %p1097_p9 }
  0x23   : > { %p1093_p11 = pneg %p1092_p8 }
  0x25   : > { %p1100_p10 = pnand %p1099_p5, %p1093_p11 }
  0x27   : > { %1103 = shalt.err (!%p1100_p10)
}
  0x28   : > { %s1173_s26 = smov 128   ;;  %s1174_s28 = smov 8  }
  0x29   : > { %1024 = dma.hbm_to_vmem [thread:$0]  (!%p1271_p12), %s1421_s2, 512, %s200_s11, [#allocation3], %s1173_s26, %s1173_s26, %s1174_s28  }
  0x2a   : > { %p1433_p13 = scmp.ne.s32.totalorder %s1431_s9, 0 }
  0x2b   : > { %p1434_p1 = scmp.eq.s32.totalorder (!%p1433_p13), %s1235_s25, 0 }
  0x2c   : > { %240 = sbr.rel (%p1433_p13) target bundleno = 815 (0x32f), region = 44 }
  0x33   : > { %1149 = dma.done.wait (%p1434_p1), [#allocation3], 512   ;;  %p1435_p0 = pmov %p1434_p1 }
  0x34   : > { %p275_p5 = scmp.lt.s32.totalorder %s1235_s25, 1  ;;  %v1175_v8 = vmov 0.0   ;;  %v303_v9 = vld [vmem:[#allocation2] sm:$0xff]  ;;  %vm1176_vm0 = vmmov 0   ;;  %v305_v10 = vld [vmem:[#allocation2 + $0x8] sm:$0xff]  ;;  %v307_v11 = vlaneseq  ;;  %vm313_vm1 = vcmask 64512  }
  0x35   : > { %1151 = vsyncadd (%p1435_p0), [#allocation3], 4294966784  ;;  %966 = vmatprep.subr.mxu1 %v1175_v8  ;;  %961 = vmatprep.subr.mxu0 %v1175_v8  ;;  %v544_v20 = vld [vmem:[#allocation2 + $0x18] sm:$0xff]  ;;  %v464_v23 = vld [vmem:[#allocation2 + $0x10] sm:$0xff]  ;;  %v1177_v32 = vmov 0.0|0.0   ;;  %vm631_vm2 = vcmask 261120  }
  0x36   : > { %s276_s13 = scalar_select %p275_p5, %s1235_s25, 1  ;;  %967 = vmatpush3.msra.mxu1 %v303_v9  ;;  %968 = vmatprep.mubr.msk.f32.mxu1 %vm1176_vm0, %v1175_v8  ;;  %v308_v12 = vand.u32 127, %v307_v11  ;;  %v1323_v13 = vshrl.u32 %v307_v11, 7  ;;  %v626_v27 = vld [vmem:[%s1423_s4] sm:$0xff]  ;;  %v627_v28 = vld [vmem:[%s1423_s4 + $0x8] sm:$0xff]  ;;  %v628_v34 = vld [vmem:[%s1423_s4 + $0x10] sm:$0xff] }
  0x37   : > { %963 = vmatprep.mubr.msk.f32.mxu0 %vm1176_vm0, %v1175_v8  ;;  %976 = vmatprep.subr.mxu1 %v1175_v8  ;;  %v929_v29 = vld [vmem:[%s1423_s4 + $0x20] sm:$0xff]  ;;  %v1004_v30 = vpack.c.bf16 %v627_v28, %v626_v27  ;;  %v930_v31 = vld [vmem:[%s1423_s4 + $0x28] sm:$0xff]  ;;  %v629_v35 = vld [vmem:[%s1423_s4 + $0x18] sm:$0xff]  ;;  %s942_s15 = sshll.u32 %s1235_s25, 8  ;;  %p1436_p9 = scmp.ne.s32.totalorder %s1429_s7, 0 }
  0x38   : > { %s940_s14 = sshll.u32 %s276_s13, 4  ;;  %962 = vmatpush3.msra.mxu0 %v305_v10  ;;  %v311_v14 = vsub.s32 %v308_v12, %v1323_v13  ;;  %v1010_v33 = vpack.c.bf16 %v930_v31, %v929_v29  ;;  %v1007_v36 = vpack.c.bf16 %v629_v35, %v628_v34  ;;  %v931_v37 = vld [vmem:[%s1423_s4 + $0x30] sm:$0xff]  ;;  %v932_v38 = vld [vmem:[%s1423_s4 + $0x38] sm:$0xff]  ;;  %v623_v50 = vld [vmem:[%s1422_s3] sm:$0x1]  ;;  %v794_v10 = vsub.s32 0, %v1323_v13 }
  0x39   : > { %s279_s16 = scalar_lea.vmem %s1419_s0, %s940_s14  ;;  %s284_s9 = scalar_lea.vmem %s1420_s1, %s940_s14  ;;  %971 = vmatprep.subr.mxu0 %v1175_v8  ;;  %v1013_v39 = vpack.c.bf16 %v932_v38, %v931_v37  ;;  %v630_v54 = vld [vmem:[%s1424_s5] sm:$0x1]  ;;  %v933_v55 = vld [vmem:[%s1424_s5 + $0x1] sm:$0x1] }
  0x3a   : > { %v1305_v0 = vld [vmem:[%s279_s16] sm:$0xff]  ;;  %v1307_v1 = vld [vmem:[%s279_s16 + $0x8] sm:$0xff]  ;;  %s272_s13 = sand.u32 1, %s1162_s22   ;;  %s1178_s19 = smov [#allocation5]  }
  0x3b   : > { %v1309_v2 = vld [vmem:[%s284_s9] sm:$0xff]  ;;  %v289_v3 = vadd.f32 %v1307_v1, %v1305_v0  ;;  %v1313_v4 = vld [vmem:[%s284_s9 + $0x8] sm:$0xff]  ;;  %v293_v6 = vmax.f32 %v1305_v0, %v1307_v1  ;;  %s919_s14 = sshll.u32 %s272_s13, 4  ;;  %s1377_s9 = scalar_lea.hbm %s1425_s6, %s942_s15 }
  0x3c   : > { %v296_v5 = vadd.f32 %v1313_v4, %v1309_v2  ;;  %v300_v7 = vmax.f32 %v1309_v2, %v1313_v4  ;;  %s274_s12 = scalar_lea.vmem [#allocation5], %s919_s14  ;;  %s816_s25 = scalar_lea.sflag [#allocation4], %s272_s13 }
  0x3d   : > { %290 = vadd.xlane.f32.xlu0 %v289_v3  ;;  %s830_s16 = sshll.u32 %s274_s12, 4  ;;  %s1108_s20 = sshll.u32 %s1178_s19, 4  ;;  %s1379_s16 = int_to_ptr.vmem [resolvable:$true] %s830_s16  ;;  %s1109_s20 = int_to_ptr.vmem [resolvable:$false] %s1108_s20 }
  0x3e   : > { %297 = vadd.xlane.f32.xlu1 %v296_v5  ;;  %s1104_s18 = scalar_lea.vmem %s1379_s16, 256  ;;  %s1110_s26 = scalar_lea.vmem %s1109_s20, 512 }
  0x3f   : > { %p1105_p6 = scmp.ne.s32.totalorder %s1379_s16, %s1104_s18  ;;  %p1111_p2 = scmp.lt.s32.totalorder %s1379_s16, %s1109_s20 }
  0x40   : > { %p1112_p3 = scmp.lt.s32.totalorder %s1110_s26, %s1104_s18 }
  0x41   : > { %294 = vmax.xlane.f32.xlu0 %v293_v6  ;;  %p1106_p10 = pnand %p1105_p6, %p1436_p9 }
  0x42   : > { %301 = vmax.xlane.f32.xlu1 %v300_v7  ;;  %p1113_p4 = por %p1112_p3, %p1111_p2 }
  0x43   : > { %p1107_p12 = pneg %p1106_p10 }
  0x45   : > { %p1114_p7 = pnand %p1113_p4, %p1107_p12 }
  0xca   : > { %v291_v15 = vpop.xlane.xlu0 %290 }
  0xcb   : > { %v292_v16 = vmul.f32 0.00390625, %v291_v15  ;;  %v298_v17 = vpop.xlane.xlu1 %297 }
  0xcc   : > { %v299_v19 = vmul.f32 0.00390625, %v298_v17 }
  0xcd   : > { %v390_v18 = vrot.slane %v292_v16, %v311_v14 }
  0xce   : > { %v295_v21 = vpop.xlane.xlu0 %294  ;;  %v469_v26 = vrot.slane %v299_v19, %v311_v14 }
  0xcf   : > { %v312_v22 = vrot.slane %v295_v21, %v311_v14  ;;  %969 = vmatmul.mubr.msk.f32.vlgmr.msra.gmra.mrb[0].mxu1 %vm313_vm1, %v390_v18  ;;  %v302_v24 = vpop.xlane.xlu1 %301 }
  0xd0   : > { %v549_v25 = vrot.slane %v302_v24, %v311_v14  ;;  %977 = vmatpush3.msra.mxu1 %v544_v20  ;;  %978 = vmatprep.mubr.msk.f32.mxu1 %vm1176_vm0, %v1175_v8 }
  0xd1   : > { %964 = vmatmul.mubr.msk.f32.vlgmr.msra.gmra.mrb[0].mxu0 %vm313_vm1, %v312_v22  ;;  %1009 = vmatprep.subr.bf16.mxu1 %v1177_v32 }
  0xd2   : > { %972 = vmatpush3.msra.mxu0 %v464_v23  ;;  %973 = vmatprep.mubr.msk.f32.mxu0 %vm1176_vm0, %v1175_v8 }
  0xd3   : > { %979 = vmatmul.mubr.msk.f32.vlgmr.msra.gmra.mrb[2].mxu1 %vm313_vm1, %v549_v25  ;;  %1003 = vmatprep.subr.bf16.mxu0 %v1177_v32 }
  0xd4   : > { %1000 = vmatprep.mubr.msk.f32.mxu1 %vm1176_vm0, %v1175_v8  ;;  %1011 = vmatpush3.bf16.msra.mxu1 %v1010_v33 }
  0xd5   : > { %974 = vmatmul.mubr.msk.f32.vlgmr.msra.gmra.mrb[2].mxu0 %vm313_vm1, %v469_v26  ;;  %1012 = vmatprep.subr.bf16.mxu1 %v1177_v32 }
  0xd6   : > { %989 = vmatprep.mubr.msk.f32.mxu0 %vm1176_vm0, %v1175_v8  ;;  %1005 = vmatpush3.bf16.msra.mxu0 %v1004_v30 }
  0xd7   : > { %1006 = vmatprep.subr.bf16.mxu0 %v1177_v32 }
  0xd8   : > { %1014 = vmatpush3.bf16.msra.mxu1 %v1013_v39 }
  0xda   : > { %1008 = vmatpush3.bf16.msra.mxu0 %v1007_v36 }
 0x1a2   : > { %v459_v40 = vpop.f32.mrb[0].mxu1 }
 0x1a3   : > { %v970_v41 = vpop.f32.mrb[1].mxu1 }
 0x1a4   : > { %v382_v42 = vpop.f32.mrb[0].mxu0 }
 0x1a5   : > { %v460_v43 = vadd.f32 %v459_v40, %v382_v42  ;;  %v965_v44 = vpop.f32.mrb[1].mxu0 }
 0x1a6   : > { %v618_v45 = vpop.f32.mrb[2].mxu1 }
 0x1a7   : > { %v980_v46 = vpop.f32.mrb[3].mxu1 }
 0x1a8   : > { %v538_v47 = vpop.f32.mrb[2].mxu0 }
 0x1a9   : > { %v542_v48 = vadd.f32 %v538_v47, %v460_v43  ;;  %v975_v49 = vpop.f32.mrb[3].mxu0 }
 0x1ab   : > { %v622_v51 = vadd.f32 %v618_v45, %v542_v48 }
 0x1ad   : > { %v624_v52 = vadd.f32 %v623_v50, %v622_v51 }
 0x1af   : > { %v625_v53 = vmax.f32 %v624_v52, 0.0 }
 0x1b1   : > { %990 = vmatmul.mubr.msk.f32.vlgmr.msra.gmra.mrb[4].mxu0 %vm631_vm2, %v625_v53  ;;  %1001 = vmatmul.mubr.msk.f32.vlgmr.msra.gmra.mrb[4].mxu1 %vm631_vm2, %v625_v53 }
 0x284   : > { %v701_v56 = vpop.f32.mrb[4].mxu0  ;;  %v778_v57 = vpop.f32.mrb[4].mxu1 }
 0x285   : > { %v702_v58 = vadd.f32 %v701_v56, %v630_v54  ;;  %v779_v59 = vadd.f32 %v933_v55, %v778_v57  ;;  %v991_v60 = vpop.f32.mrb[5].mxu0  ;;  %v1002_v61 = vpop.f32.mrb[5].mxu1 }
 0x287   : > { %v782_v62 = vmax.f32 %v702_v58, %v779_v59 }
 0x289   : > { %v783_v63 = vsub.f32 %v702_v58, %v782_v62  ;;  %v786_v3 = vsub.f32 %v779_v59, %v782_v62 }
 0x28b   : > { %v784_v5 = vmul.f32 1.442695, %v783_v63  ;;  %v787_v6 = vmul.f32 1.442695, %v786_v3 }
 0x28d   : > { %1070 = vpow2.f32 %v784_v5 }
 0x28e   : > { %1072 = vpow2.f32 %v787_v6 }
 0x297   : > { %v1071_v7 = vpop.eup %1070 }
 0x298   : > { %v1073_v8 = vpop.eup %1072 }
 0x299   : > { %v789_v9 = vadd.f32 %v1073_v8, %v1071_v7 }
 0x29b   : > { %1074 = vrcp.f32 %v789_v9 }
 0x2a5   : > { %v1075_v11 = vpop.eup %1074 }
 0x2a6   : > { %v799_v12 = vmul.f32 %v1075_v11, %v1073_v8  ;;  %v791_v14 = vmul.f32 %v1075_v11, %v1071_v7 }
 0x2a8   : > { %v803_v15 = vrot.slane %v799_v12, %v794_v10  ;;  %v795_v16 = vrot.slane %v791_v14, %v794_v10 }
 0x2aa   : > { %805 = vbcast.lane.b32.xlu1 %v803_v15, 256  ;;  %797 = vbcast.lane.b32.xlu0 %v795_v16, 256 }
 0x31c   : > { %v806_v17 = vpop.permute.xlu1 %805  ;;  %v798_v18 = vpop.permute.xlu0 %797 }
 0x31d   : > { %v809_v19 = vmul.f32 %v806_v17, %v1309_v2  ;;  %v810_v20 = vmul.f32 %v806_v17, %v1313_v4  ;;  %v807_v13 = vmul.f32 %v798_v18, %v1305_v0  ;;  %v808_v21 = vmul.f32 %v798_v18, %v1307_v1 }
 0x31f   : > { %v811_v22 = vadd.f32 %v809_v19, %v807_v13  ;;  %v812_v23 = vadd.f32 %v810_v20, %v808_v21 }
 0x321   : > { %813 = vst [vmem:[%s274_s12] sm:$0xff] %v811_v22  ;;  %814 = vst [vmem:[%s274_s12 + $0x8] sm:$0xff] %v812_v23 }
 0x322   : > { %1117 = shalt.err (!%p1114_p7)
}
 0x323   : > { %s1118_s28 = scalar_lea.hbm %s1377_s9, 256  ;;  %s1122_s13 = scalar_lea.hbm %s1425_s6, 512 }
 0x324   : > { %p1119_p8 = scmp.ne.s32.totalorder %s1377_s9, %s1118_s28  ;;  %p1123_p1 = scmp.lt.u32.totalorder %s1377_s9, %s1425_s6 }
 0x325   : > { %p1124_p0 = scmp.lt.u32.totalorder %s1122_s13, %s1118_s28  ;;  %p1126_p6 = scmp.lt.u32.totalorder %s1118_s28, %s1377_s9 }
 0x326   : > { %p1120_p11 = pnand %p1119_p8, %p1436_p9 }
 0x327   : > { %p1125_p5 = por %p1124_p0, %p1123_p1 }
 0x328   : > { %p1121_p13 = pneg %p1120_p11 }
 0x329   : > { %p1127_p10 = por %p1126_p6, %p1125_p5 }
 0x32b   : > { %p1128_p12 = pnand %p1127_p10, %p1121_p13 }
 0x32d   : > { %1131 = shalt.err (!%p1128_p12)
}
 0x32e   : > { %1019 = dma.vmem_to_hbm [thread:$0]  (%p1436_p9), %s1379_s16, 256, %s1377_s9, %s816_s25  }
 0x32f PF: > { %p1031_p2 = scmp.ge.s32.totalorder %s1170_s24, 2  ;;  %s842_s12 = sand.u32 1, %s1158_s21  }
 0x330   : > { %p1437_p3 = scmp.ne.s32.totalorder %s1430_s8, 0  ;;  %s843_s17 = scalar_lea.sflag [#allocation4], %s842_s12 }
 0x332   : > { %p1026_p4 = pnand %p1031_p2, %p1437_p3 }
 0x334   : > { %1153 = dma.done.wait (!%p1026_p4), %s843_s17, 256  }
 0x335   : > { %1155 = vsyncadd (!%p1026_p4), %s843_s17, 4294967040  ;;  %p17_p7 = scmp.ge.s32.totalorder %s1239_s27, 4   ;;  %s1438_s21 = smov %s1162_s22 }
 0x336   : > { %s1439_s22 = smov %s1166_s23  ;;  %s1440_s23 = smov %s1250_s30 }
 0x337   : > { %s1441_s24 = smov %s1239_s27  ;;  %19 = sbr.rel (!%p17_p7) target bundleno = 4 (0x4), region = 92 }
 0x33e   :  { %848 = vsyncpa [#allocation3], 1 }
 0x33f   :  { %850 = vsyncpa [#allocation3 + $0x1], 1 }
 0x340   :  { %851 = vsyncpa [#allocation4], 1 }
 0x341   :  { %853 = vsyncpa [#allocation4 + $0x1], 1 }

</bundles_post_ra>
